<compile_context>
chip_gen: v7x
topology: tpu7x:2x2x1
jax: 0.10.0
libtpu: 0.0.40
codegen_flags: <defaults>
</compile_context>

<pallas_src>
import functools

import jax
import jax.numpy as jnp
from jax.experimental import pallas as pl
from jax.experimental.pallas import tpu as pltpu

_T = 3.0
_EPS = 1e-7


def _pairwise_sum(vals):
    """Tree-sum a list of equal-shaped arrays using only elementwise (VPU) adds."""
    vals = list(vals)
    while len(vals) > 1:
        nxt = [vals[i] + vals[i + 1] for i in range(0, len(vals) - 1, 2)]
        if len(vals) % 2:
            nxt.append(vals[-1])
        vals = nxt
    return vals[0]


def _row_sum(x, ones_mat, c):
    """Class-axis (lane) sum, keepdims-style.

    If `ones_mat` is given, the sum runs on the otherwise-idle MXU via a dot
    with a ones (C,128) matrix (Precision.HIGHEST so f32 numerics are kept);
    for C == 128 the result is already lane-replicated so no keepdims
    broadcast is needed.  Otherwise it is a standard XLU lane reduction.
    """
    if ones_mat is not None:
        s = jnp.dot(x, ones_mat, preferred_element_type=jnp.float32,
                    precision=jax.lax.Precision.HIGHEST)   # (rows, 128) replicated
        return s if c == 128 else s[:, 0:1]
    return jnp.sum(x, axis=-1, keepdims=True)


def _kl_div_kernel(pred_ref, label_ref, out_ref, *, n_total, tile_n, c,
                   mask_rows, use_mxu_rowsum):
    inv_t = 1.0 / _T

    p = pred_ref[...].astype(jnp.float32) * inv_t
    l = label_ref[...].astype(jnp.float32) * inv_t

    ones_mat = jnp.ones((c, 128), jnp.float32) if use_mxu_rowsum else None

    # log_softmax(pred / T) along the class (last / lane) axis.
    p_max = jnp.max(p, axis=-1, keepdims=True)            # XLU row max
    p_shift = p - p_max
    sum_exp_p = _row_sum(jnp.exp(p_shift), ones_mat, c)
    predict = p_shift - jnp.log(sum_exp_p)

    # softmax(label / T) + eps.  Exact divide kept for PyTorch parity
    # (pl.reciprocal(approx=True) would perturb ~1e-4).
    l_max = jnp.max(l, axis=-1, keepdims=True)
    l_exp = jnp.exp(l - l_max)
    sum_exp_l = _row_sum(l_exp, ones_mat, c)
    target = l_exp * (1.0 / sum_exp_l) + _EPS

    # log(target) = log(softmax + eps), matching the PyTorch numerics.
    kl = target * (jnp.log(target) - predict)

    # Narrow (tile_n, 1) row mask for wrapper row-padding / ragged last tile.
    # Keep this a select: garbage rows of a ragged block may hold NaN/Inf.
    if mask_rows:
        row_ids = jax.lax.broadcasted_iota(jnp.int32, (tile_n, 1), 0)
        valid = (row_ids + pl.program_id(0) * tile_n) < n_total
        kl = jnp.where(valid, kl, 0.0)

    # Reduce kl to a single lane-dense (8, 128) block with pure VPU adds:
    #   1) fold lane-blocks of 128 onto each other (free aligned slices),
    #   2) fold 8-row vreg groups onto each other.
    # No cross-lane XLU rotate tree, no scalar broadcast, no jnp.full fill.
    if c == 128:
        lane_acc = kl
    elif c % 128 == 0:
        lane_acc = _pairwise_sum([kl[:, j * 128:(j + 1) * 128]
                                  for j in range(c // 128)])
    else:
        lane_acc = jnp.sum(kl, axis=-1, keepdims=True)     # fallback: XLU reduce

    if tile_n == 8:
        block = lane_acc
    else:
        block = _pairwise_sum([lane_acc[r * 8:(r + 1) * 8, :]
                               for r in range(tile_n // 8)])

    if block.shape[-1] != 128:                             # only for C % 128 != 0
        block = jnp.pad(block, ((0, 0), (0, 128 - block.shape[-1])))

    out_ref[...] = block.reshape(out_ref.shape).astype(out_ref.dtype)


def _vmem_budget_and_limit():
    """Generation-aware (block-DMA budget, vmem_limit_bytes)."""
    try:
        phys = int(pltpu.get_tpu_info().vmem_capacity_bytes)
    except Exception:
        phys = None
    if phys is not None and phys >= 128 * 1024 * 1024:     # v5e / v6e (128 MiB)
        return 16 * 1024 * 1024, 48 * 1024 * 1024
    return 8 * 1024 * 1024, 30 * 1024 * 1024               # v7x-class (64 MiB) / unknown


def _choose_tile_n(n_pad, c, budget_bytes):
    # 2 inputs x 2 pipeline buffers of a (tile_n, c) f32 block must fit budget.
    bytes_per_row = 4 * c * 4
    max_rows = (budget_bytes // bytes_per_row) // 8 * 8
    if max_rows < 8:
        # TODO(synk): add class-axis tiling (online softmax over C blocks) for
        # vocab-scale C; a single (8, C) block would blow VMEM here.
        raise ValueError(f"class dimension C={c} too wide for a single-block class axis")
    tile = min(1024, max_rows)
    return n_pad if n_pad <= tile else tile


def kl_div_loss(pred, label, *, tile_n=None, offload_row_sums_to_mxu=False):
    """Scalar KL distillation loss (T=3) matching the PyTorch KLDivLoss module.

    pred/label: (N, C), class axis last. bf16 inputs are accepted (upcast to
    f32 inside the kernel), which halves HBM traffic on v5e/v6e if desired.
    """
    assert pred.shape == label.shape and pred.ndim == 2
    n, c = pred.shape
    budget_bytes, vmem_limit = _vmem_budget_and_limit()

    # Pad rows to a multiple of 8 (sublane) so the in-kernel 8-row fold is
    # exact; padded rows are zero and masked out inside the kernel.
    n_pad = ((n + 7) // 8) * 8
    if n_pad != n:
        pad = ((0, n_pad - n), (0, 0))
        pred = jnp.pad(pred, pad)
        label = jnp.pad(label, pad)

    if tile_n is None:
        tile_n = _choose_tile_n(n_pad, c, budget_bytes)
    assert tile_n % 8 == 0 and tile_n <= n_pad, "row tile must be a multiple of 8 and <= padded N"

    grid = pl.cdiv(n_pad, tile_n)
    mask_rows = (grid * tile_n) != n
    use_mxu_rowsum = bool(offload_row_sums_to_mxu) and (c % 128 == 0) and (c <= 4096)

    kernel = functools.partial(
        _kl_div_kernel, n_total=n, tile_n=tile_n, c=c,
        mask_rows=mask_rows, use_mxu_rowsum=use_mxu_rowsum)

    partials = pl.pallas_call(
        kernel,
        out_shape=jax.ShapeDtypeStruct((grid, 8, 128), jnp.float32),
        grid=(grid,),
        in_specs=[
            pl.BlockSpec((tile_n, c), lambda i: (i, 0)),
            pl.BlockSpec((tile_n, c), lambda i: (i, 0)),
        ],
        out_specs=pl.BlockSpec((1, 8, 128), lambda i: (i, 0, 0)),
        compiler_params=pltpu.CompilerParams(
            dimension_semantics=("parallel",),   # shards across v7x's 2 TCs
            vmem_limit_bytes=vmem_limit,
        ),
    )(pred, label)

    return (_T * _T / n) * jnp.sum(partials)


def _reference(pred, label):
    predict = jax.nn.log_softmax(pred / _T, axis=1)
    target = jax.nn.softmax(label / _T, axis=1) + _EPS
    return _T * _T * (jnp.sum(target * (jnp.log(target) - predict)) / pred.shape[0])


if __name__ == "__main__":
    key = jax.random.PRNGKey(0)
    k1, k2, k3, k4, k5, k6 = jax.random.split(key, 6)

    # Test 1: single tile, lane-aligned, rows already a multiple of 8.
    pred1 = jax.random.normal(k1, (8, 128), dtype=jnp.float32)
    label1 = jax.random.normal(k2, (8, 128), dtype=jnp.float32)
    out1 = kl_div_loss(pred1, label1)
    jax.block_until_ready(out1)
    ref1 = _reference(pred1, label1)
    assert jnp.allclose(out1, ref1, rtol=1e-5, atol=1e-5), (out1, ref1)

    # Test 2: multi-tile parallel grid with a ragged last Pallas block.
    pred2 = jax.random.normal(k3, (24, 128), dtype=jnp.float32)
    label2 = jax.random.normal(k4, (24, 128), dtype=jnp.float32)
    out2 = kl_div_loss(pred2, label2, tile_n=16)
    jax.block_until_ready(out2)
    ref2 = _reference(pred2, label2)
    assert jnp.allclose(out2, ref2, rtol=1e-5, atol=1e-5), (out2, ref2)

    # Test 3: batch not a multiple of 8 (exercises wrapper row padding + mask).
    pred3 = jax.random.normal(k5, (10, 128), dtype=jnp.float32)
    label3 = jax.random.normal(k6, (10, 128), dtype=jnp.float32)
    out3 = kl_div_loss(pred3, label3)
    jax.block_until_ready(out3)
    ref3 = _reference(pred3, label3)
    assert jnp.allclose(out3, ref3, rtol=1e-5, atol=1e-5), (out3, ref3)

    print("KERNEL_OK")
</pallas_src>

<mosaic_0001>
module attributes {stable_mosaic.version = 11 : i64} {
  func.func @_kl_div_kernel(%arg0: i32, %arg1: memref<8x128xf32, #tpu.memory_space<vmem>>, %arg2: memref<8x128xf32, #tpu.memory_space<vmem>>, %arg3: memref<1x8x128xf32, #tpu.memory_space<vmem>>) attributes {dimension_semantics = [#tpu.dimension_semantics<parallel>], iteration_bounds = array<i64: 1>, scalar_prefetch = 0 : i64, scratch_operands = 0 : i64, tpu.core_type = #tpu.core_type<tc>, window_params = [{transform_indices = @transform_0, window_bounds = array<i64: 8, 128>}, {transform_indices = @transform_1, window_bounds = array<i64: 8, 128>}, {transform_indices = @transform_2, window_bounds = array<i64: 1, 8, 128>}]} {
    %c0 = arith.constant 0 : index
    %c0_0 = arith.constant 0 : index
    %0 = vector.load %arg1[%c0, %c0_0] : memref<8x128xf32, #tpu.memory_space<vmem>>, vector<8x128xf32>
    %cst = arith.constant 0.333333343 : f32
    %1 = vector.broadcast %cst : f32 to vector<8x128xf32>
    %2 = arith.mulf %0, %1 : vector<8x128xf32>
    %c0_1 = arith.constant 0 : index
    %c0_2 = arith.constant 0 : index
    %3 = vector.load %arg2[%c0_1, %c0_2] : memref<8x128xf32, #tpu.memory_space<vmem>>, vector<8x128xf32>
    %cst_3 = arith.constant 0.333333343 : f32
    %4 = vector.broadcast %cst_3 : f32 to vector<8x128xf32>
    %5 = arith.mulf %3, %4 : vector<8x128xf32>
    %cst_4 = arith.constant dense<0xFF800000> : vector<8xf32>
    %6 = vector.multi_reduction <maximumf>, %2, %cst_4 [1] : vector<8x128xf32> to vector<8xf32>
    %7 = vector.shape_cast %6 : vector<8xf32> to vector<8x1xf32>
    %8 = vector.broadcast %7 : vector<8x1xf32> to vector<8x128xf32>
    %9 = arith.subf %2, %8 : vector<8x128xf32>
    %10 = math.exp %9 : vector<8x128xf32>
    %cst_5 = arith.constant dense<0.000000e+00> : vector<8xf32>
    %11 = vector.multi_reduction <add>, %10, %cst_5 [1] : vector<8x128xf32> to vector<8xf32>
    %12 = vector.shape_cast %11 : vector<8xf32> to vector<8x1xf32>
    %13 = math.log %12 : vector<8x1xf32>
    %14 = vector.broadcast %13 : vector<8x1xf32> to vector<8x128xf32>
    %15 = arith.subf %9, %14 : vector<8x128xf32>
    %cst_6 = arith.constant dense<0xFF800000> : vector<8xf32>
    %16 = vector.multi_reduction <maximumf>, %5, %cst_6 [1] : vector<8x128xf32> to vector<8xf32>
    %17 = vector.shape_cast %16 : vector<8xf32> to vector<8x1xf32>
    %18 = vector.broadcast %17 : vector<8x1xf32> to vector<8x128xf32>
    %19 = arith.subf %5, %18 : vector<8x128xf32>
    %20 = math.exp %19 : vector<8x128xf32>
    %cst_7 = arith.constant dense<0.000000e+00> : vector<8xf32>
    %21 = vector.multi_reduction <add>, %20, %cst_7 [1] : vector<8x128xf32> to vector<8xf32>
    %22 = vector.shape_cast %21 : vector<8xf32> to vector<8x1xf32>
    %cst_8 = arith.constant 1.000000e+00 : f32
    %23 = vector.broadcast %cst_8 : f32 to vector<8x1xf32>
    %24 = arith.divf %23, %22 : vector<8x1xf32>
    %25 = vector.broadcast %24 : vector<8x1xf32> to vector<8x128xf32>
    %26 = arith.mulf %20, %25 : vector<8x128xf32>
    %cst_9 = arith.constant 1.000000e-07 : f32
    %27 = vector.broadcast %cst_9 : f32 to vector<8x128xf32>
    %28 = arith.addf %26, %27 : vector<8x128xf32>
    %29 = math.log %28 : vector<8x128xf32>
    %30 = arith.subf %29, %15 : vector<8x128xf32>
    %31 = arith.mulf %28, %30 : vector<8x128xf32>
    %32 = vector.shape_cast %31 : vector<8x128xf32> to vector<1x8x128xf32>
    %c0_10 = arith.constant 0 : index
    %c0_11 = arith.constant 0 : index
    %c0_12 = arith.constant 0 : index
    %33 = vector.load %arg3[%c0_10, %c0_11, %c0_12] : memref<1x8x128xf32, #tpu.memory_space<vmem>>, vector<1x8x128xf32>
    tpu.vector_store %arg3[%c0_10, %c0_11, %c0_12], %32 {strides = array<i32>} : memref<1x8x128xf32, #tpu.memory_space<vmem>>, vector<1x8x128xf32>,
    return
  }
  func.func @transform_0(%arg0: i32) -> (i32, i32) {
    %c0_i32 = arith.constant 0 : i32
    %c0_i32_0 = arith.constant 0 : i32
    return %arg0, %c0_i32 : i32, i32
  }
  func.func @transform_1(%arg0: i32) -> (i32, i32) {
    %c0_i32 = arith.constant 0 : i32
    %c0_i32_0 = arith.constant 0 : i32
    return %arg0, %c0_i32 : i32, i32
  }
  func.func @transform_2(%arg0: i32) -> (i32, i32, i32) {
    %c0_i32 = arith.constant 0 : i32
    %c0_i32_0 = arith.constant 0 : i32
    %c0_i32_1 = arith.constant 0 : i32
    return %arg0, %c0_i32, %c0_i32_0 : i32, i32, i32
  }
}

</mosaic_0001>

<bundles_post_ra>
// kernel: tpu_custom_call.1
= control target key start
LH: loop header
LB: loop body
LE: loop exit
PB: predicated region body
PF: predicated region fallthrough
CT: control target
= control target key end

     0   :  { %7 = vsyncpa [#allocation3], 0  ;;  %s221_s0 = inlined_call_operand.hbm [shape: f32[8,128], index: 0, kind: input, shape index: {}]   ;;  %s222_s1 = inlined_call_operand.hbm [shape: f32[8,128], index: 1, kind: input, shape index: {}]   ;;  %s223_s2 = inlined_call_operand.hbm [shape: f32[1,8,128], index: 2, kind: output, shape index: {}]  }
   0x1   :  { %8 = vsyncpa [#allocation6], 0 }
   0x2   :  { %9 = vsyncpa [#allocation4], 0  ;;  %s167_s9 = smov [#allocation2]   ;;  %s168_s11 = smov [#allocation5]  }
   0x3   :  { %s16_s10 = sshll.u32 %s167_s9, 4  ;;  %s26_s12 = sshll.u32 %s168_s11, 4  ;;  %s17_s10 = int_to_ptr.vmem [resolvable:$true] %s16_s10  ;;  %s27_s12 = int_to_ptr.vmem [resolvable:$true] %s26_s12 }
   0x4   :  { %s95_s15 = scalar_lea.hbm %s221_s0, 128 }
   0x5   :  { %p96_p0 = scmp.ne.s32.totalorder %s221_s0, %s95_s15  ;;  %p99_p1 = scmp.lt.u32.totalorder %s95_s15, %s221_s0 }
   0x7   :  { %p101_p2 = pnand %p99_p1, %p96_p0 }
   0x9   :  { %104 = shalt.err (!%p101_p2)
}
   0xa   :  { %s105_s20 = scalar_lea.vmem %s17_s10, 128  ;;  %p110_p4 = scmp.lt.s32.totalorder %s17_s10, %s17_s10 }
   0xb   :  { %p106_p3 = scmp.ne.s32.totalorder %s17_s10, %s105_s20  ;;  %p111_p5 = scmp.lt.s32.totalorder %s105_s20, %s105_s20 }
   0xd   :  { %p112_p6 = por %p111_p5, %p110_p4 }
   0xf   :  { %p113_p7 = pnand %p112_p6, %p106_p3 }
  0x11   :  { %116 = shalt.err (!%p113_p7)
}
  0x12   :  { %19 = dma.hbm_to_vmem [thread:$0]  %s221_s0, 128, %s17_s10, [#allocation3]  }
  0x13   :  { %s117_s25 = scalar_lea.hbm %s222_s1, 128 }
  0x14   :  { %p118_p8 = scmp.ne.s32.totalorder %s222_s1, %s117_s25  ;;  %p121_p9 = scmp.lt.u32.totalorder %s117_s25, %s222_s1 }
  0x16   :  { %p123_p10 = pnand %p121_p9, %p118_p8 }
  0x18   :  { %126 = shalt.err (!%p123_p10)
}
  0x19   :  { %s127_s30 = scalar_lea.vmem %s27_s12, 128  ;;  %p132_p12 = scmp.lt.s32.totalorder %s27_s12, %s27_s12 }
  0x1a   :  { %p128_p11 = scmp.ne.s32.totalorder %s27_s12, %s127_s30  ;;  %p133_p13 = scmp.lt.s32.totalorder %s127_s30, %s127_s30 }
  0x1c   :  { %p134_p0 = por %p133_p13, %p132_p12 }
  0x1e   :  { %p135_p1 = pnand %p134_p0, %p128_p11 }
  0x20   :  { %138 = shalt.err (!%p135_p1)
}
  0x21   :  { %29 = dma.hbm_to_vmem [thread:$0]  %s222_s1, 128, %s27_s12, [#allocation6]  }
  0x22   :  { %161 = dma.done.wait [#allocation3], 128  }
  0x23   :  { %162 = vsyncadd [#allocation3], 4294967168 }
  0x24   :  { %163 = dma.done.wait [#allocation6], 128  }
  0x25   :  { %164 = vsyncadd [#allocation6], 4294967168  ;;  %v38_v0 = vld [vmem:[#allocation5] sm:$0xff]  ;;  %v36_v1 = vld [vmem:[#allocation2] sm:$0xff]  ;;  %s169_s1 = smov [#allocation7]  }
  0x26   :  { %v39_v2 = vmul.f32 0.33333334, %v38_v0  ;;  %v37_v3 = vmul.f32 0.33333334, %v36_v1  ;;  %s72_s4 = sshll.u32 %s169_s1, 4  ;;  %s73_s4 = int_to_ptr.vmem [resolvable:$true] %s72_s4 }
  0x27   :  { %s139_s5 = scalar_lea.vmem %s73_s4, 128  ;;  %p144_p3 = scmp.lt.s32.totalorder %s73_s4, %s73_s4 }
  0x28   :  { %50 = vmax.xlane.f32.xlu0 %v39_v2  ;;  %p140_p2 = scmp.ne.s32.totalorder %s73_s4, %s139_s5  ;;  %p145_p4 = scmp.lt.s32.totalorder %s139_s5, %s139_s5 }
  0x2a   :  { %p146_p5 = por %p145_p4, %p144_p3 }
  0x2c   :  { %40 = vmax.xlane.f32.xlu0 %v37_v3  ;;  %p147_p6 = pnand %p146_p5, %p140_p2 }
  0xb5   :  { %v51_v4 = vpop.xlane.xlu0 %50 }
  0xb6   :  { %v52_v5 = vsub.f32 %v39_v2, %v51_v4 }
  0xb8   :  { %v53_v6 = vmul.f32 1.442695, %v52_v5 }
  0xb9   :  { %v41_v7 = vpop.xlane.xlu0 %40 }
  0xba   :  { %85 = vpow2.f32 %v53_v6  ;;  %v42_v8 = vsub.f32 %v37_v3, %v41_v7 }
  0xbc   :  { %v43_v9 = vmul.f32 1.442695, %v42_v8 }
  0xbe   :  { %87 = vpow2.f32 %v43_v9 }
  0xc4   :  { %v86_v10 = vpop.eup %85 }
  0xc5   :  { %55 = vadd.xlane.f32.xlu1 %v86_v10 }
  0xc8   :  { %v88_v11 = vpop.eup %87 }
  0xc9   :  { %45 = vadd.xlane.f32.xlu1 %v88_v11 }
 0x152   :  { %v56_v12 = vpop.xlane.xlu1 %55 }
 0x153   :  { %89 = vrcp.f32 %v56_v12 }
 0x156   :  { %v46_v13 = vpop.xlane.xlu1 %45 }
 0x157   :  { %91 = vlog2.f32 %v46_v13 }
 0x15d   :  { %v90_v14 = vpop.eup %89 }
 0x15e   :  { %v59_v15 = vmul.f32 %v90_v14, %v86_v10 }
 0x160   :  { %v60_v16 = vadd.f32 1e-07, %v59_v15 }
 0x161   :  { %v92_v17 = vpop.eup %91 }
 0x162   :  { %93 = vlog2.f32 %v60_v16  ;;  %v48_v18 = vmul.f32 0.6931472, %v92_v17 }
 0x164   :  { %v49_v20 = vsub.f32 %v42_v8, %v48_v18 }
 0x16c   :  { %v94_v19 = vpop.eup %93 }
 0x16d   :  { %v62_v21 = vmul.f32 0.6931472, %v94_v19 }
 0x16f   :  { %v63_v22 = vsub.f32 %v62_v21, %v49_v20 }
 0x171   :  { %v64_v23 = vmul.f32 %v63_v22, %v60_v16 }
 0x173   :  { %65 = vst [vmem:[#allocation7] sm:$0xff] %v64_v23 }
 0x174   :  { %150 = shalt.err (!%p147_p6)
}
 0x175   :  { %s151_s8 = scalar_lea.hbm %s223_s2, 128 }
 0x176   :  { %p152_p7 = scmp.ne.s32.totalorder %s223_s2, %s151_s8  ;;  %p155_p8 = scmp.lt.u32.totalorder %s151_s8, %s223_s2 }
 0x178   :  { %p157_p9 = pnand %p155_p8, %p152_p7 }
 0x17a   :  { %160 = shalt.err (!%p157_p9)
}
 0x17b   :  { %75 = dma.vmem_to_hbm [thread:$0]  %s73_s4, 128, %s223_s2, [#allocation4]  }
 0x17c   :  { %165 = dma.done.wait [#allocation4], 128  }
 0x17d   :  { %166 = vsyncadd [#allocation4], 4294967168 }
 0x17e   :  { %79 = vsyncpa [#allocation3], 1 }
 0x17f   :  { %80 = vsyncpa [#allocation6], 1 }
 0x180   :  { %81 = vsyncpa [#allocation4], 1 }

</bundles_post_ra>
